<compile_context>
chip_gen: v6e
topology: v6e:2x2x1
jax: 0.10.0
libtpu: 0.0.40
codegen_flags: <defaults>
</compile_context>

<pallas_src>
import functools
import re

import jax
import jax.numpy as jnp
from jax.experimental import pallas as pl
from jax.experimental.pallas import tpu as pltpu


def _cdiv(a, b):
    return -(-a // b)


def _round_up(a, b):
    return _cdiv(a, b) * b


def _tpu_generation():
    try:
        kind = jax.devices()[0].device_kind
    except Exception:
        return 0
    m = re.search(r"(\d+)", kind)
    return int(m.group(1)) if m else 0


def _sumsq_kernel(x_ref, out_ref, acc_ref, *, num_inner, total_rows, needs_mask):
    # x_ref:   (TM, L) tile of the lane-dense view of the sample
    # out_ref: (8, L)  per-parallel-split partial sums (resident over inner axis)
    # acc_ref: (8, L)  f32 vreg-shaped running accumulator
    i = pl.program_id(1)

    @pl.when(i == 0)
    def _():
        acc_ref[...] = jnp.zeros_like(acc_ref)

    tm, lanes = x_ref.shape
    x = x_ref[...].astype(jnp.float32)
    x2 = x * x

    if needs_mask:
        # Zero out rows past the real array (ragged last block / clamped
        # over-coverage blocks).  Uses the *logical* (unclamped) block index.
        p = pl.program_id(0)
        row0 = (p * num_inner + i) * tm
        row_ids = row0 + jax.lax.broadcasted_iota(jnp.int32, (tm, lanes), 0)
        x2 = jnp.where(row_ids < total_rows, x2, 0.0)

    # (TM, L) -> (TM//8, 8, L): splits only the sublane-major dim (layout-free);
    # the axis-0 reduction is vreg-wise VPU adds, no per-step XLU scalar reduce.
    acc_ref[...] += jnp.sum(x2.reshape(tm // 8, 8, lanes), axis=0)

    @pl.when(i == pl.num_programs(1) - 1)
    def _():
        out_ref[...] = acc_ref[...]


def unsupervised_inn_loss(sample, logdet, *, target_block_bytes=None,
                          num_parallel=None):
    """sample: (B, C, H, W) (any rank >= 2, any float dtype), logdet: (B,) -> f32 loss."""
    assert logdet.ndim == 1, "logdet must be rank-1 (matches the torch assert)"
    B = sample.shape[0]

    n_elems = 1
    for d in sample.shape:
        n_elems *= int(d)

    gen = _tpu_generation()
    if num_parallel is None:
        num_parallel = 2 if gen >= 7 else 1          # 2 TCs only on v7x
    if target_block_bytes is None:
        target_block_bytes = (8 << 20) if gen >= 6 else (4 << 20)

    # Pick the widest lane count (multiple of 128) that exactly divides the
    # element count, so the reshape is a free contiguous bitcast (no HBM copy).
    # Fallback: the native last dim, which always divides exactly.
    for cand in (512, 256, 128):
        if n_elems % cand == 0:
            L = cand
            break
    else:
        L = int(sample.shape[-1])
    rows = n_elems // L

    itemsize = jnp.dtype(sample.dtype).itemsize
    row_align = 8 * max(1, 4 // itemsize)            # f32: 8, bf16: 16, int8/fp8: 32
    tm_target = max(row_align,
                    (target_block_bytes // (L * itemsize)) // row_align * row_align)
    tm = min(tm_target, _round_up(rows, row_align))

    num_blocks = _cdiv(rows, tm)
    num_splits = min(num_parallel, num_blocks)
    num_inner = _cdiv(num_blocks, num_splits)
    needs_mask = (num_splits * num_inner * tm) != rows

    x = sample.reshape(rows, L)                      # contiguous reshape: free

    def in_index_map(p, i):
        blk = p * num_inner + i
        # Clamp so any over-coverage block (fully masked in-kernel) still reads
        # in-bounds data instead of going OOB.
        return (jnp.minimum(blk, num_blocks - 1), 0)

    kernel = functools.partial(_sumsq_kernel, num_inner=num_inner,
                               total_rows=rows, needs_mask=needs_mask)

    partials = pl.pallas_call(
        kernel,
        out_shape=jax.ShapeDtypeStruct((num_splits * 8, L), jnp.float32),
        grid_spec=pltpu.PrefetchScalarGridSpec(
            num_scalar_prefetch=0,
            grid=(num_splits, num_inner),
            in_specs=[pl.BlockSpec((tm, L), in_index_map)],
            out_specs=pl.BlockSpec((8, L), lambda p, i: (p, 0)),
            scratch_shapes=[pltpu.VMEM((8, L), jnp.float32)],
        ),
        compiler_params=pltpu.CompilerParams(
            dimension_semantics=("parallel", "arbitrary"),
        ),
        cost_estimate=pl.CostEstimate(
            flops=2 * n_elems,
            transcendentals=0,
            bytes_accessed=num_splits * num_inner * tm * L * itemsize
                           + num_splits * 8 * L * 4,
        ),
    )(x)

    sum_sq = jnp.sum(partials)                       # tiny (num_splits*8, L) reduce
    inv_b = 1.0 / jnp.float32(B)
    return 0.5 * sum_sq * inv_b - jnp.mean(logdet.astype(jnp.float32))


def _reference_loss(sample, logdet):
    nll = 0.5 * jnp.sum(sample.astype(jnp.float32) ** 2, axis=(1, 2, 3))
    return jnp.mean(nll) - jnp.mean(logdet.astype(jnp.float32))


if __name__ == "__main__":
    key = jax.random.PRNGKey(0)
    k1, k2 = jax.random.split(key)

    B, C, H, W = 2, 4, 16, 16
    sample = jax.random.normal(k1, (B, C, H, W), dtype=jnp.float32)
    logdet = jax.random.normal(k2, (B,), dtype=jnp.float32)

    loss = unsupervised_inn_loss(sample, logdet)
    loss = jax.block_until_ready(loss)

    ref = _reference_loss(sample, logdet)
    assert jnp.allclose(loss, ref, rtol=1e-5, atol=1e-5), (loss, ref)

    print("KERNEL_OK")
</pallas_src>

<mosaic_0001>
module attributes {stable_mosaic.version = 11 : i64} {
  func.func @_sumsq_kernel(%arg0: i32, %arg1: i32, %arg2: memref<8x512xf32, #tpu.memory_space<vmem>>, %arg3: memref<8x512xf32, #tpu.memory_space<vmem>>, %arg4: memref<8x512xf32, #tpu.memory_space<vmem>>) attributes {dimension_semantics = [#tpu.dimension_semantics<parallel>, #tpu.dimension_semantics<arbitrary>], iteration_bounds = array<i64: 1, 1>, scalar_prefetch = 0 : i64, scratch_operands = 1 : i64, tpu.core_type = #tpu.core_type<tc>, window_params = [{transform_indices = @transform_0, window_bounds = array<i64: 8, 512>}, {transform_indices = @transform_1, window_bounds = array<i64: 8, 512>}]} {
    %c0_i32 = arith.constant 0 : i32
    %0 = arith.cmpi eq, %arg1, %c0_i32 : i32
    %1 = arith.extui %0 : i1 to i32
    %c0_i32_0 = arith.constant 0 : i32
    %2 = arith.cmpi ne, %1, %c0_i32_0 : i32
    scf.if %2 {
      %cst_9 = arith.constant 0.000000e+00 : f32
      %23 = vector.broadcast %cst_9 : f32 to vector<8x512xf32>
      %c0_10 = arith.constant 0 : index
      %c0_11 = arith.constant 0 : index
      %24 = vector.load %arg4[%c0_10, %c0_11] : memref<8x512xf32, #tpu.memory_space<vmem>>, vector<8x512xf32>
      tpu.vector_store %arg4[%c0_10, %c0_11], %23 {strides = array<i32>} : memref<8x512xf32, #tpu.memory_space<vmem>>, vector<8x512xf32>,
    } else {
    }
    %c0 = arith.constant 0 : index
    %c0_1 = arith.constant 0 : index
    %3 = vector.load %arg2[%c0, %c0_1] : memref<8x512xf32, #tpu.memory_space<vmem>>, vector<8x512xf32>
    %4 = arith.mulf %3, %3 : vector<8x512xf32>
    %c1_i32 = arith.constant 1 : i32
    %5 = arith.muli %arg0, %c1_i32 : i32
    %6 = arith.addi %5, %arg1 : i32
    %c8_i32 = arith.constant 8 : i32
    %7 = arith.muli %6, %c8_i32 : i32
    %8 = tpu.iota {dimensions = array<i32: 0>} : vector<8x512xi32>
    %9 = vector.broadcast %7 : i32 to vector<8x512xi32>
    %10 = arith.addi %9, %8 : vector<8x512xi32>
    %c4_i32 = arith.constant 4 : i32
    %11 = vector.broadcast %c4_i32 : i32 to vector<8x512xi32>
    %12 = arith.cmpi slt, %10, %11 : vector<8x512xi32>
    %cst = arith.constant 0.000000e+00 : f32
    %13 = vector.broadcast %cst : f32 to vector<8x512xf32>
    %14 = arith.select %12, %4, %13 : vector<8x512xi1>, vector<8x512xf32>
    %c0_2 = arith.constant 0 : index
    %c0_3 = arith.constant 0 : index
    %15 = vector.load %arg4[%c0_2, %c0_3] : memref<8x512xf32, #tpu.memory_space<vmem>>, vector<8x512xf32>
    %16 = vector.shape_cast %14 : vector<8x512xf32> to vector<1x8x512xf32>
    %cst_4 = arith.constant dense<0.000000e+00> : vector<8x512xf32>
    %17 = vector.multi_reduction <add>, %16, %cst_4 [0] : vector<1x8x512xf32> to vector<8x512xf32>
    %18 = arith.addf %15, %17 : vector<8x512xf32>
    %c0_5 = arith.constant 0 : index
    %c0_6 = arith.constant 0 : index
    %19 = vector.load %arg4[%c0_5, %c0_6] : memref<8x512xf32, #tpu.memory_space<vmem>>, vector<8x512xf32>
    tpu.vector_store %arg4[%c0_5, %c0_6], %18 {strides = array<i32>} : memref<8x512xf32, #tpu.memory_space<vmem>>, vector<8x512xf32>,
    %c0_i32_7 = arith.constant 0 : i32
    %20 = arith.cmpi eq, %arg1, %c0_i32_7 : i32
    %21 = arith.extui %20 : i1 to i32
    %c0_i32_8 = arith.constant 0 : i32
    %22 = arith.cmpi ne, %21, %c0_i32_8 : i32
    scf.if %22 {
      %c0_9 = arith.constant 0 : index
      %c0_10 = arith.constant 0 : index
      %23 = vector.load %arg4[%c0_9, %c0_10] : memref<8x512xf32, #tpu.memory_space<vmem>>, vector<8x512xf32>
      %c0_11 = arith.constant 0 : index
      %c0_12 = arith.constant 0 : index
      %24 = vector.load %arg3[%c0_11, %c0_12] : memref<8x512xf32, #tpu.memory_space<vmem>>, vector<8x512xf32>
      tpu.vector_store %arg3[%c0_11, %c0_12], %23 {strides = array<i32>} : memref<8x512xf32, #tpu.memory_space<vmem>>, vector<8x512xf32>,
    } else {
    }
    return
  }
  func.func @transform_0(%arg0: i32, %arg1: i32) -> (i32, i32) {
    %c1_i32 = arith.constant 1 : i32
    %0 = arith.muli %arg0, %c1_i32 : i32
    %1 = arith.addi %0, %arg1 : i32
    %c0_i32 = arith.constant 0 : i32
    %2 = arith.minsi %1, %c0_i32 : i32
    %c0_i32_0 = arith.constant 0 : i32
    %c0_i32_1 = arith.constant 0 : i32
    return %2, %c0_i32_0 : i32, i32
  }
  func.func @transform_1(%arg0: i32, %arg1: i32) -> (i32, i32) {
    %c0_i32 = arith.constant 0 : i32
    %c0_i32_0 = arith.constant 0 : i32
    return %arg0, %c0_i32 : i32, i32
  }
}

</mosaic_0001>

<bundles_post_ra>
// kernel: tpu_custom_call.1
= control target key start
LH: loop header
LB: loop body
LE: loop exit
PB: predicated region body
PF: predicated region fallthrough
CT: control target
= control target key end

     0   :  { %6 = vsyncpa [#allocation4], 0  ;;  %s193_s0 = inlined_call_operand.hbm [shape: f32[4,512], index: 0, kind: input, shape index: {}]   ;;  %s194_s1 = inlined_call_operand.hbm [shape: f32[8,512], index: 1, kind: output, shape index: {}]  }
   0x1   :  { %7 = vsyncpa [#allocation5], 0 }
   0x2   :  { %19 = vsyncadd [#allocation4], 256  ;;  %s173_s6 = smov [#allocation3]  }
   0x3   :  { %s25_s7 = sshll.u32 %s173_s6, 4  ;;  %s26_s7 = int_to_ptr.vmem [resolvable:$true] %s25_s7 }
   0x4   :  { %s137_s8 = scalar_lea.vmem %s26_s7, 256  ;;  %s141_s9 = scalar_lea.vmem %s26_s7, 512 }
   0x5   :  { %p138_p0 = scmp.ne.s32.totalorder %s26_s7, %s137_s8  ;;  %p142_p1 = scmp.lt.s32.totalorder %s26_s7, %s26_s7 }
   0x6   :  { %p143_p2 = scmp.lt.s32.totalorder %s141_s9, %s137_s8 }
   0x8   :  { %p144_p3 = por %p143_p2, %p142_p1 }
   0xa   :  { %p145_p4 = pnand %p144_p3, %p138_p0 }
   0xc   :  { %148 = shalt.err (!%p145_p4)
}
   0xd   :  { %s174_s10 = smov 256   ;;  %s175_s11 = smov 16  }
   0xe   :  { %31 = dma.hbm_to_vmem [thread:$0]  %s193_s0, 256, %s26_s7, [#allocation4], %s174_s10, %s174_s10, %s175_s11  }
   0xf   :  { %169 = dma.done.wait [#allocation4], 512  }
  0x10   :  { %170 = vsyncadd [#allocation4], 4294966784  ;;  %v60_v0 = vlaneseq  ;;  %v50_v2 = vld [vmem:[#allocation3] sm:$0xff]  ;;  %v52_v3 = vld [vmem:[#allocation3 + $0x10] sm:$0xff]  ;;  %s176_s14 = smov [#allocation6]  }
  0x11   :  { %v51_v4 = vld [vmem:[#allocation3 + $0x8] sm:$0xff]  ;;  %v54_v5 = vmul.f32 %v50_v2, %v50_v2  ;;  %v56_v6 = vmul.f32 %v52_v3, %v52_v3  ;;  %v53_v7 = vld [vmem:[#allocation3 + $0x18] sm:$0xff]  ;;  %s114_s15 = sshll.u32 %s176_s14, 4  ;;  %s115_s15 = int_to_ptr.vmem [resolvable:$true] %s114_s15 }
  0x12   :  { %v61_v1 = vshrl.u32 %v60_v0, 7  ;;  %v55_v8 = vmul.f32 %v51_v4, %v51_v4  ;;  %v57_v9 = vmul.f32 %v53_v7, %v53_v7  ;;  %s149_s0 = scalar_lea.vmem %s115_s15, 512  ;;  %p154_p6 = scmp.lt.s32.totalorder %s115_s15, %s115_s15 }
  0x13   :  { %v69_v10 = vcombine.low %v54_v5, %v56_v6  ;;  %v70_v11 = vcombine.high %v54_v5, %v56_v6  ;;  %p150_p5 = scmp.ne.s32.totalorder %s115_s15, %s149_s0  ;;  %p155_p7 = scmp.lt.s32.totalorder %s149_s0, %s149_s0 }
  0x14   :  { %vm64_vm0 = vcmp.lt.s32.totalorder %v61_v1, 4  ;;  %v71_v12 = vcombine.low %v55_v8, %v57_v9  ;;  %v72_v13 = vcombine.high %v55_v8, %v57_v9 }
  0x15   :  { %v77_v14 = vsel %vm64_vm0, %v69_v10, 0.0  ;;  %v78_v15 = vsel %vm64_vm0, %v70_v11, 0.0  ;;  %p156_p8 = por %p155_p7, %p154_p6 }
  0x16   :  { %104 = vst [vmem:[#allocation6] sm:$0xff] %v77_v14  ;;  %105 = vst [vmem:[#allocation6 + $0x8] sm:$0xff] %v78_v15  ;;  %v79_v16 = vsel %vm64_vm0, %v71_v12, 0.0  ;;  %v80_v17 = vsel %vm64_vm0, %v72_v13, 0.0 }
  0x17   :  { %106 = vst [vmem:[#allocation6 + $0x10] sm:$0xff] %v79_v16  ;;  %107 = vst [vmem:[#allocation6 + $0x18] sm:$0xff] %v80_v17  ;;  %p157_p9 = pnand %p156_p8, %p150_p5 }
  0x19   :  { %160 = shalt.err (!%p157_p9)
}
  0x1a   :  { %117 = dma.vmem_to_hbm [thread:$0]  %s115_s15, 512, %s194_s1, [#allocation5]  }
  0x1b   :  { %171 = dma.done.wait [#allocation5], 512  }
  0x1c   :  { %172 = vsyncadd [#allocation5], 4294966784 }
  0x1d   :  { %121 = vsyncpa [#allocation4], 1 }
  0x1e   :  { %122 = vsyncpa [#allocation5], 1 }

</bundles_post_ra>
